<compile_context>
chip_gen: v5e
topology: v5e:2x2
jax: 0.10.0
libtpu: 0.0.40
codegen_flags: <defaults>
</compile_context>

<pallas_src>
import jax
import jax.numpy as jnp
from jax import lax
from jax.experimental import pallas as pl
from jax.experimental.pallas import tpu as pltpu

EPS = 1e-5  # matches nn.BatchNorm2d / nn.InstanceNorm2d defaults


# --------------------------------------------------------------------------
# Kernels
# --------------------------------------------------------------------------
def _bn_stats_kernel(x_ref, stats_ref, psum_ref, psq_ref):
    """Per-row sum / sum-of-squares over the lane (last) axis.

    x_ref:     (tn, tc, tl) tile (BatchNorm half / generic rows).
    stats_ref: (tn, tc, 2)  packed [sum, sumsq]; resident across the lane axis.
    psum_ref / psq_ref: (tn, tc, 128) f32 per-lane partials -- the cross-lane
    (XLU) reduction is deferred to the last lane step.
    """
    l = pl.program_id(2)

    @pl.when(l == 0)
    def _():
        psum_ref[...] = jnp.zeros_like(psum_ref)
        psq_ref[...] = jnp.zeros_like(psq_ref)

    x = x_ref[...].astype(jnp.float32)
    tl = x.shape[-1]
    if tl % 128 == 0 and tl // 128 <= 64:
        # 128-lane-aligned slices: pure VPU adds, no relayout, no XLU per step.
        s = psum_ref[...]
        q = psq_ref[...]
        for off in range(0, tl, 128):
            seg = x[:, :, off:off + 128]
            s = s + seg
            q = q + seg * seg
        psum_ref[...] = s
        psq_ref[...] = q
    else:
        # Ragged lane extent: plain per-step reduction into lane 0.
        psum_ref[:, :, 0:1] += jnp.sum(x, axis=-1, keepdims=True)
        psq_ref[:, :, 0:1] += jnp.sum(x * x, axis=-1, keepdims=True)

    @pl.when(l == pl.num_programs(2) - 1)
    def _():
        stats_ref[:, :, 0:1] = jnp.sum(psum_ref[...], axis=-1, keepdims=True)
        stats_ref[:, :, 1:2] = jnp.sum(psq_ref[...], axis=-1, keepdims=True)


def _fused_norm_kernel(x_ref, ss_ref, o_ref):
    """Pass 2 (even C). Grid axis 1 selects the half:

    h == 0: BatchNorm half    -> out = x * scale + shift (folded batch stats).
    h == 1: InstanceNorm half -> per-row stats on the resident full-H*W block,
            centered variance, normalize, write (single read of this half).
    """
    h = pl.program_id(1)
    x = x_ref[...].astype(jnp.float32)            # (tn, tc, HW)

    @pl.when(h == 0)
    def _():
        ss = ss_ref[...]                          # (tn, tc, 2) = [scale, shift]
        o_ref[...] = (x * ss[:, :, 0:1] + ss[:, :, 1:2]).astype(o_ref.dtype)

    @pl.when(h == 1)
    def _():
        inv_hw = 1.0 / x.shape[-1]
        mean = jnp.sum(x, axis=-1, keepdims=True) * inv_hw
        xc = x - mean
        var = jnp.sum(xc * xc, axis=-1, keepdims=True) * inv_hw
        o_ref[...] = (xc * lax.rsqrt(var + EPS)).astype(o_ref.dtype)


def _scale_shift_kernel(x_ref, ss_ref, o_ref):
    """Generic streaming pass: out = x * scale + shift (ss packs both)."""
    x = x_ref[...].astype(jnp.float32)
    ss = ss_ref[...]
    o_ref[...] = (x * ss[:, :, 0:1] + ss[:, :, 1:2]).astype(o_ref.dtype)


# --------------------------------------------------------------------------
# Tiling / hardware helpers
# --------------------------------------------------------------------------
def _sublane_quantum(itemsize):
    # Native sublane packing: f32 -> 8, bf16 -> 16, int8/fp8 -> 32.
    return {4: 8, 2: 16, 1: 32}.get(int(itemsize), 8)


def _lane_tile(L, max_tl):
    """Largest multiple-of-128 divisor of L (<= max_tl); else the full extent."""
    upper = min(max_tl, (L // 128) * 128)
    for cand in range(upper, 0, -128):
        if L % cand == 0:
            return cand
    return L


def _pick_tile(extent, max_tile, sub):
    """Second-to-last-dim tile: a divisor of `extent` that is a multiple of 8
    (layout legality), preferably of `sub` (dtype sublane quantum), and at
    most `max_tile`; falls back to the full extent (always legal)."""
    cands = {extent}
    for t in range(8, extent, 8):
        if extent % t == 0:
            cands.add(t)
    pref = [t for t in cands if t <= max_tile and t % sub == 0]
    if pref:
        return max(pref)
    ok = [t for t in cands if t <= max_tile]
    if ok:
        return max(ok)
    return min(cands)


def _pick_leading_tile(extent, max_tile):
    """Leading (batch) tile: largest divisor of `extent` that is <= max_tile."""
    best = 1
    for t in range(1, extent + 1):
        if extent % t == 0 and t <= max_tile:
            best = t
    return best


def _tpu_caps():
    """Returns (usable VMEM budget in bytes, is_v7x). Generation-aware."""
    is_v7 = False
    try:
        kind = jax.devices()[0].device_kind.lower().replace(" ", "")
        is_v7 = ("v7" in kind) or ("tpu7" in kind)
    except Exception:
        pass
    cap = (64 << 20) if is_v7 else (128 << 20)
    try:
        cap = int(pltpu.get_tpu_info().vmem_capacity_bytes)
    except Exception:
        pass
    budget = max(16 << 20, min(cap // 2, 64 << 20))
    return budget, is_v7


# --------------------------------------------------------------------------
# Wrappers
# --------------------------------------------------------------------------
def _ibnorm_general(x_nchw, gamma, beta, budget, sub):
    """Generic path (odd channel split): per-row stats for every (n, c) row,
    BN aggregation in JAX, then a streaming scale/shift pass."""
    N, C, H, W = x_nchw.shape
    cb = C // 2
    HW = H * W
    R = N * C
    x3 = x_nchw.reshape(1, R, HW)

    tl = _lane_tile(HW, 4096)
    max_rows_s = max(1, min(64, (2 << 20) // max(tl * 4, 1)))
    tr_s = _pick_tile(R, max_rows_s, sub)

    stats = pl.pallas_call(
        _bn_stats_kernel,
        out_shape=jax.ShapeDtypeStruct((1, R, 2), jnp.float32),
        grid=(1, R // tr_s, HW // tl),
        in_specs=[pl.BlockSpec((1, tr_s, tl), lambda a, r, l: (0, r, l))],
        out_specs=pl.BlockSpec((1, tr_s, 2), lambda a, r, l: (0, r, 0)),
        scratch_shapes=[pltpu.VMEM((1, tr_s, 128), jnp.float32),
                        pltpu.VMEM((1, tr_s, 128), jnp.float32)],
        compiler_params=pltpu.CompilerParams(
            dimension_semantics=(pltpu.PARALLEL, pltpu.PARALLEL,
                                 pltpu.ARBITRARY),
            vmem_limit_bytes=budget),
    )(x3)

    sums = stats[0, :, 0].reshape(N, C)
    sqs = stats[0, :, 1].reshape(N, C)
    gamma_f = gamma.astype(jnp.float32).reshape(cb)
    beta_f = beta.astype(jnp.float32).reshape(cb)

    cnt_b = float(N * HW)
    s_b = jnp.sum(sums[:, :cb], axis=0)
    q_b = jnp.sum(sqs[:, :cb], axis=0)
    mean_b = s_b / cnt_b
    var_b = jnp.maximum(q_b / cnt_b - mean_b * mean_b, 0.0)
    scale_b = lax.rsqrt(var_b + EPS) * gamma_f
    shift_b = beta_f - mean_b * scale_b
    scale_b = jnp.broadcast_to(scale_b[None, :], (N, cb))
    shift_b = jnp.broadcast_to(shift_b[None, :], (N, cb))

    mean_i = sums[:, cb:] / float(HW)
    var_i = jnp.maximum(sqs[:, cb:] / float(HW) - mean_i * mean_i, 0.0)
    scale_i = lax.rsqrt(var_i + EPS)
    shift_i = -mean_i * scale_i

    scale = jnp.concatenate([scale_b, scale_i], axis=1)
    shift = jnp.concatenate([shift_b, shift_i], axis=1)
    ss = jnp.stack([scale, shift], axis=-1).reshape(1, R, 2)

    max_rows_n = max(1, min(budget // 9, 4 << 20) // max(tl * 4, 1))
    tr_n = _pick_tile(R, max_rows_n, sub)

    out3 = pl.pallas_call(
        _scale_shift_kernel,
        out_shape=jax.ShapeDtypeStruct((1, R, HW), x_nchw.dtype),
        grid=(1, R // tr_n, HW // tl),
        in_specs=[pl.BlockSpec((1, tr_n, tl), lambda a, r, l: (0, r, l)),
                  pl.BlockSpec((1, tr_n, 2), lambda a, r, l: (0, r, 0))],
        out_specs=pl.BlockSpec((1, tr_n, tl), lambda a, r, l: (0, r, l)),
        compiler_params=pltpu.CompilerParams(
            dimension_semantics=(pltpu.PARALLEL, pltpu.PARALLEL,
                                 pltpu.PARALLEL),
            vmem_limit_bytes=budget),
    )(x3, ss)

    return out3.reshape(N, C, H, W)


def ibnorm(x_nchw, gamma, beta):
    """IBNorm forward. x_nchw: (N, C, H, W); gamma/beta: (C//2,)."""
    N, C, H, W = x_nchw.shape
    cb = C // 2
    HW = H * W
    itemsize = int(jnp.dtype(x_nchw.dtype).itemsize)
    sub = _sublane_quantum(itemsize)
    budget, is_v7 = _tpu_caps()
    row_sem = pltpu.CORE_PARALLEL if is_v7 else pltpu.PARALLEL

    if C % 2 != 0 or cb == 0:
        # Odd channel split: halves cannot be viewed as a clean (N,2,cb,HW)
        # slab; use the generic per-row two-pass path.
        return _ibnorm_general(x_nchw, gamma, beta, budget, sub)

    # (N, C, H, W) -> (N, 2, cb, H*W): contiguous, free reshape.
    # [:, 0] = BatchNorm channels, [:, 1] = InstanceNorm channels.
    x4 = x_nchw.reshape(N, 2, cb, HW)

    # ------------- pass 1: BN-half per-(n, c) sum / sumsq (half the reads) --
    tl_s = _lane_tile(HW, 4096)
    max_rows_s = max(1, min(64, (2 << 20) // max(tl_s * 4, 1)))
    tc_s = _pick_tile(cb, max_rows_s, sub)
    tn_cap = max(1, max_rows_s // tc_s)
    if is_v7 and N >= 2:
        tn_cap = max(1, min(tn_cap, N // 2))      # keep >= 2 blocks for 2 TCs
    tn_s = _pick_leading_tile(N, tn_cap)

    stats = pl.pallas_call(
        _bn_stats_kernel,
        out_shape=jax.ShapeDtypeStruct((N, cb, 2), jnp.float32),
        grid=(N // tn_s, cb // tc_s, HW // tl_s),
        in_specs=[pl.BlockSpec((tn_s, None, tc_s, tl_s),
                               lambda n, c, l: (n, 0, c, l))],
        out_specs=pl.BlockSpec((tn_s, tc_s, 2), lambda n, c, l: (n, c, 0)),
        scratch_shapes=[pltpu.VMEM((tn_s, tc_s, 128), jnp.float32),
                        pltpu.VMEM((tn_s, tc_s, 128), jnp.float32)],
        compiler_params=pltpu.CompilerParams(
            dimension_semantics=(row_sem, pltpu.PARALLEL, pltpu.ARBITRARY),
            vmem_limit_bytes=budget),
    )(x4)

    # ------ fold BN batch stats + gamma/beta into per-channel scale/shift ---
    gamma_f = gamma.astype(jnp.float32).reshape(cb)
    beta_f = beta.astype(jnp.float32).reshape(cb)
    cnt_b = float(N * HW)
    s_b = jnp.sum(stats[:, :, 0], axis=0)
    q_b = jnp.sum(stats[:, :, 1], axis=0)
    mean_b = s_b / cnt_b
    var_b = jnp.maximum(q_b / cnt_b - mean_b * mean_b, 0.0)
    scale_b = lax.rsqrt(var_b + EPS) * gamma_f
    shift_b = beta_f - mean_b * scale_b
    ss = jnp.broadcast_to(
        jnp.stack([scale_b, shift_b], axis=-1)[None, :, :], (N, cb, 2))

    # ------- pass 2: fused BN scale/shift + IN (stats + normalize) ----------
    max_blk_n = min(budget // 9, 8 << 20)   # in+out double-buffered + f32 temps
    max_rows_n = max(1, max_blk_n // max(HW * 4, 1))
    tc_n = _pick_tile(cb, max_rows_n, sub)
    tn_cap_n = max(1, max_rows_n // tc_n)
    if is_v7 and N >= 2:
        tn_cap_n = max(1, min(tn_cap_n, N // 2))
    tn_n = _pick_leading_tile(N, tn_cap_n)

    out4 = pl.pallas_call(
        _fused_norm_kernel,
        out_shape=jax.ShapeDtypeStruct((N, 2, cb, HW), x_nchw.dtype),
        grid=(N // tn_n, 2, cb // tc_n),
        in_specs=[pl.BlockSpec((tn_n, None, tc_n, HW),
                               lambda n, h, c: (n, h, c, 0)),
                  pl.BlockSpec((tn_n, tc_n, 2), lambda n, h, c: (n, c, 0))],
        out_specs=pl.BlockSpec((tn_n, None, tc_n, HW),
                               lambda n, h, c: (n, h, c, 0)),
        compiler_params=pltpu.CompilerParams(
            dimension_semantics=(row_sem, pltpu.PARALLEL, pltpu.PARALLEL),
            vmem_limit_bytes=budget),
    )(x4, ss)

    return out4.reshape(N, C, H, W)


# --------------------------------------------------------------------------
# Pure-JAX reference (matches PyTorch IBNorm.forward, BN in training mode)
# --------------------------------------------------------------------------
def ibnorm_ref(x, gamma, beta):
    N, C, H, W = x.shape
    cb = C // 2
    xb = x[:, :cb].astype(jnp.float32)
    xi = x[:, cb:].astype(jnp.float32)

    mu_b = xb.mean(axis=(0, 2, 3), keepdims=True)
    var_b = ((xb - mu_b) ** 2).mean(axis=(0, 2, 3), keepdims=True)
    bn = (xb - mu_b) / jnp.sqrt(var_b + EPS)
    bn = bn * gamma.reshape(1, cb, 1, 1) + beta.reshape(1, cb, 1, 1)

    mu_i = xi.mean(axis=(2, 3), keepdims=True)
    var_i = ((xi - mu_i) ** 2).mean(axis=(2, 3), keepdims=True)
    inr = (xi - mu_i) / jnp.sqrt(var_i + EPS)

    return jnp.concatenate([bn, inr], axis=1).astype(x.dtype)


if __name__ == "__main__":
    key = jax.random.PRNGKey(0)
    kx, kg, kb = jax.random.split(key, 3)

    N, C, H, W = 2, 4, 16, 16
    cb = C // 2

    x = jax.random.normal(kx, (N, C, H, W), dtype=jnp.float32)
    # PyTorch default init is gamma=1, beta=0; perturb to exercise the path.
    gamma = 1.0 + 0.1 * jax.random.normal(kg, (cb,), dtype=jnp.float32)
    beta = 0.1 * jax.random.normal(kb, (cb,), dtype=jnp.float32)

    out = ibnorm(x, gamma, beta)
    jax.block_until_ready(out)

    ref = ibnorm_ref(x, gamma, beta)
    assert out.shape == (N, C, H, W)
    assert jnp.allclose(out, ref, rtol=1e-4, atol=1e-4), "mismatch vs reference"

    print("KERNEL_OK")
</pallas_src>

<mosaic_0001>
module attributes {stable_mosaic.version = 11 : i64} {
  func.func @_bn_stats_kernel(%arg0: i32, %arg1: i32, %arg2: i32, %arg3: memref<2x1x2x256xf32, #tpu.memory_space<vmem>>, %arg4: memref<2x2x2xf32, #tpu.memory_space<vmem>>, %arg5: memref<2x2x128xf32, #tpu.memory_space<vmem>>, %arg6: memref<2x2x128xf32, #tpu.memory_space<vmem>>) attributes {dimension_semantics = [#tpu.dimension_semantics<parallel>, #tpu.dimension_semantics<parallel>, #tpu.dimension_semantics<arbitrary>], iteration_bounds = array<i64: 1, 1, 1>, scalar_prefetch = 0 : i64, scratch_operands = 2 : i64, tpu.core_type = #tpu.core_type<tc>, window_params = [{transform_indices = @transform_0, window_bounds = array<i64: 2, 1, 2, 256>}, {transform_indices = @transform_1, window_bounds = array<i64: 2, 2, 2>}]} {
    %c0_i32 = arith.constant 0 : i32
    %0 = arith.cmpi eq, %arg2, %c0_i32 : i32
    %1 = arith.extui %0 : i1 to i32
    %c0_i32_0 = arith.constant 0 : i32
    %2 = arith.cmpi ne, %1, %c0_i32_0 : i32
    scf.if %2 {
      %cst = arith.constant 0.000000e+00 : f32
      %20 = vector.broadcast %cst : f32 to vector<2x2x128xf32>
      %c0_18 = arith.constant 0 : index
      %c0_19 = arith.constant 0 : index
      %c0_20 = arith.constant 0 : index
      %21 = vector.load %arg5[%c0_18, %c0_19, %c0_20] : memref<2x2x128xf32, #tpu.memory_space<vmem>>, vector<2x2x128xf32>
      tpu.vector_store %arg5[%c0_18, %c0_19, %c0_20], %20 {strides = array<i32>} : memref<2x2x128xf32, #tpu.memory_space<vmem>>, vector<2x2x128xf32>,
      %cst_21 = arith.constant 0.000000e+00 : f32
      %22 = vector.broadcast %cst_21 : f32 to vector<2x2x128xf32>
      %c0_22 = arith.constant 0 : index
      %c0_23 = arith.constant 0 : index
      %c0_24 = arith.constant 0 : index
      %23 = vector.load %arg6[%c0_22, %c0_23, %c0_24] : memref<2x2x128xf32, #tpu.memory_space<vmem>>, vector<2x2x128xf32>
      tpu.vector_store %arg6[%c0_22, %c0_23, %c0_24], %22 {strides = array<i32>} : memref<2x2x128xf32, #tpu.memory_space<vmem>>, vector<2x2x128xf32>,
    } else {
    }
    %c0 = arith.constant 0 : index
    %c0_1 = arith.constant 0 : index
    %c0_2 = arith.constant 0 : index
    %c0_3 = arith.constant 0 : index
    %3 = vector.load %arg3[%c0, %c0_1, %c0_2, %c0_3] : memref<2x1x2x256xf32, #tpu.memory_space<vmem>>, vector<2x1x2x256xf32>
    %4 = vector.shape_cast %3 : vector<2x1x2x256xf32> to vector<2x2x256xf32>
    %c0_4 = arith.constant 0 : index
    %c0_5 = arith.constant 0 : index
    %c0_6 = arith.constant 0 : index
    %5 = vector.load %arg5[%c0_4, %c0_5, %c0_6] : memref<2x2x128xf32, #tpu.memory_space<vmem>>, vector<2x2x128xf32>
    %c0_7 = arith.constant 0 : index
    %c0_8 = arith.constant 0 : index
    %c0_9 = arith.constant 0 : index
    %6 = vector.load %arg6[%c0_7, %c0_8, %c0_9] : memref<2x2x128xf32, #tpu.memory_space<vmem>>, vector<2x2x128xf32>
    %7 = vector.extract_strided_slice %4 {offsets = [0, 0, 0], sizes = [2, 2, 128], strides = [1, 1, 1]} : vector<2x2x256xf32> to vector<2x2x128xf32>
    %8 = arith.addf %5, %7 : vector<2x2x128xf32>
    %9 = arith.mulf %7, %7 : vector<2x2x128xf32>
    %10 = arith.addf %6, %9 : vector<2x2x128xf32>
    %11 = vector.extract_strided_slice %4 {offsets = [0, 0, 128], sizes = [2, 2, 128], strides = [1, 1, 1]} : vector<2x2x256xf32> to vector<2x2x128xf32>
    %12 = arith.addf %8, %11 : vector<2x2x128xf32>
    %13 = arith.mulf %11, %11 : vector<2x2x128xf32>
    %14 = arith.addf %10, %13 : vector<2x2x128xf32>
    %c0_10 = arith.constant 0 : index
    %c0_11 = arith.constant 0 : index
    %c0_12 = arith.constant 0 : index
    %15 = vector.load %arg5[%c0_10, %c0_11, %c0_12] : memref<2x2x128xf32, #tpu.memory_space<vmem>>, vector<2x2x128xf32>
    tpu.vector_store %arg5[%c0_10, %c0_11, %c0_12], %12 {strides = array<i32>} : memref<2x2x128xf32, #tpu.memory_space<vmem>>, vector<2x2x128xf32>,
    %c0_13 = arith.constant 0 : index
    %c0_14 = arith.constant 0 : index
    %c0_15 = arith.constant 0 : index
    %16 = vector.load %arg6[%c0_13, %c0_14, %c0_15] : memref<2x2x128xf32, #tpu.memory_space<vmem>>, vector<2x2x128xf32>
    tpu.vector_store %arg6[%c0_13, %c0_14, %c0_15], %14 {strides = array<i32>} : memref<2x2x128xf32, #tpu.memory_space<vmem>>, vector<2x2x128xf32>,
    %c0_i32_16 = arith.constant 0 : i32
    %17 = arith.cmpi eq, %arg2, %c0_i32_16 : i32
    %18 = arith.extui %17 : i1 to i32
    %c0_i32_17 = arith.constant 0 : i32
    %19 = arith.cmpi ne, %18, %c0_i32_17 : i32
    scf.if %19 {
      %c0_18 = arith.constant 0 : index
      %c0_19 = arith.constant 0 : index
      %c0_20 = arith.constant 0 : index
      %20 = vector.load %arg5[%c0_18, %c0_19, %c0_20] : memref<2x2x128xf32, #tpu.memory_space<vmem>>, vector<2x2x128xf32>
      %cst = arith.constant dense<0.000000e+00> : vector<2x2xf32>
      %21 = vector.multi_reduction <add>, %20, %cst [2] : vector<2x2x128xf32> to vector<2x2xf32>
      %22 = vector.shape_cast %21 : vector<2x2xf32> to vector<2x2x1xf32>
      %c0_21 = arith.constant 0 : index
      %c0_22 = arith.constant 0 : index
      %c0_23 = arith.constant 0 : index
      %23 = vector.load %arg4[%c0_21, %c0_22, %c0_23] : memref<2x2x2xf32, #tpu.memory_space<vmem>>, vector<2x2x1xf32>
      tpu.vector_store %arg4[%c0_21, %c0_22, %c0_23], %22 {strides = array<i32>} : memref<2x2x2xf32, #tpu.memory_space<vmem>>, vector<2x2x1xf32>,
      %c0_24 = arith.constant 0 : index
      %c0_25 = arith.constant 0 : index
      %c0_26 = arith.constant 0 : index
      %24 = vector.load %arg6[%c0_24, %c0_25, %c0_26] : memref<2x2x128xf32, #tpu.memory_space<vmem>>, vector<2x2x128xf32>
      %cst_27 = arith.constant dense<0.000000e+00> : vector<2x2xf32>
      %25 = vector.multi_reduction <add>, %24, %cst_27 [2] : vector<2x2x128xf32> to vector<2x2xf32>
      %26 = vector.shape_cast %25 : vector<2x2xf32> to vector<2x2x1xf32>
      %c0_28 = arith.constant 0 : index
      %c0_29 = arith.constant 0 : index
      %c1 = arith.constant 1 : index
      %27 = vector.load %arg4[%c0_28, %c0_29, %c1] : memref<2x2x2xf32, #tpu.memory_space<vmem>>, vector<2x2x1xf32>
      tpu.vector_store %arg4[%c0_28, %c0_29, %c1], %26 {strides = array<i32>} : memref<2x2x2xf32, #tpu.memory_space<vmem>>, vector<2x2x1xf32>,
    } else {
    }
    return
  }
  func.func @transform_0(%arg0: i32, %arg1: i32, %arg2: i32) -> (i32, i32, i32, i32) {
    %c0_i32 = arith.constant 0 : i32
    %c0_i32_0 = arith.constant 0 : i32
    return %arg0, %c0_i32, %arg1, %arg2 : i32, i32, i32, i32
  }
  func.func @transform_1(%arg0: i32, %arg1: i32, %arg2: i32) -> (i32, i32, i32) {
    %c0_i32 = arith.constant 0 : i32
    %c0_i32_0 = arith.constant 0 : i32
    return %arg0, %arg1, %c0_i32 : i32, i32, i32
  }
}

</mosaic_0001>

<bundles_post_ra>
// kernel: tpu_custom_call.1
= control target key start
LH: loop header
LB: loop body
LE: loop exit
PB: predicated region body
PF: predicated region fallthrough
CT: control target
= control target key end

     0   :  { %6 = vsyncpa [#allocation5], 0  ;;  %s197_s0 = inlined_call_operand.hbm [shape: f32[2,2,2,256], index: 0, kind: input, shape index: {}]   ;;  %s198_s1 = inlined_call_operand.hbm [shape: f32[2,2,2], index: 1, kind: output, shape index: {}]  }
   0x1   :  { %7 = vsyncpa [#allocation6], 0  ;;  %s12_s8 = sshll.u32 %s197_s0, 4  ;;  %s173_s9 = smov [#allocation4]   ;;  %s13_s8 = int_to_ptr.hbm [resolvable:$true] %s12_s8 }
   0x2   :  { %s14_s10 = sshll.u32 %s173_s9, 4  ;;  %s174_s11 = smov 128   ;;  %s15_s10 = int_to_ptr.vmem [resolvable:$true] %s14_s10 }
   0x3   :  { %s175_s12 = smov 64   ;;  %s176_s13 = smov 4  }
   0x4   :  { %20 = dma.hbm_to_vmem [thread:$0]  %s13_s8, 128, %s15_s10, [#allocation5], %s174_s11, %s175_s12, %s176_s13  }
   0x5   :  { %169 = dma.done.wait [#allocation5], 128  }
   0x6   :  { %170 = vsyncadd [#allocation5], 4294967168  ;;  %v177_v0 = vmov 0.0   ;;  %v33_v1 = vld [vmem:[#allocation4] sm:$0xf]  ;;  %vm73_vm0 = vcmask 1041408  }
   0x7   :  { %29 = vst [vmem:[#allocation2] sm:$0x3] %v177_v0  ;;  %v34_v2 = vld [vmem:[#allocation4 + $0x4] sm:$0xf]  ;;  %v41_v3 = vmul.f32 %v33_v1, %v33_v1  ;;  %v56_v4 = vrot.slane %v33_v1, 2  ;;  %vm80_vm1 = vcmask 1024  }
   0x8   :  { %30 = vst [vmem:[#allocation2 + $0x2] sm:$0x3] %v177_v0  ;;  %v42_v5 = vmul.f32 %v34_v2, %v34_v2  ;;  %v57_v6 = vrot.slane %v34_v2, 2  ;;  %vm91_vm2 = vcmask 9224   ;;  %s178_s0 = smov [#allocation7]   ;;  %s100_s17 = sshll.u32 %s198_s1, 4  ;;  %s101_s17 = int_to_ptr.hbm [resolvable:$true] %s100_s17 }
   0x9   :  { %31 = vst [vmem:[#allocation3] sm:$0x3] %v177_v0  ;;  %v60_v9 = vmul.f32 %v56_v4, %v56_v4  ;;  %s98_s14 = sshll.u32 %s178_s0, 4  ;;  %s179_s18 = smov 32   ;;  %s99_s14 = int_to_ptr.vmem [resolvable:$true] %s98_s14 }
   0xa   :  { %32 = vst [vmem:[#allocation3 + $0x2] sm:$0x3] %v177_v0  ;;  %v61_v11 = vmul.f32 %v57_v6, %v57_v6  ;;  %s180_s19 = smov 2  }
   0xb   :  { %47 = vst [vmem:[#allocation1] ss:$4 sm:$0xff] %v33_v1 }
   0xc   :  { %50 = vst [vmem:[#allocation1 + $0x20] ss:$4 sm:$0xff] %v34_v2 }
   0xe   :  { %v35_v7 = vld [vmem:[#allocation2] sm:$0x3] }
   0xf   :  { %v36_v10 = vld [vmem:[#allocation2 + $0x2] sm:$0x3]  ;;  %v39_v14 = vadd.f32 %v35_v7, %v33_v1 }
  0x10   :  { %v37_v8 = vld [vmem:[#allocation3] sm:$0x3]  ;;  %v40_v17 = vadd.f32 %v36_v10, %v34_v2 }
  0x11   :  { %v43_v12 = vadd.f32 %v41_v3, %v37_v8  ;;  %v38_v13 = vld [vmem:[#allocation3 + $0x2] sm:$0x3] }
  0x12   :  { %v44_v15 = vadd.f32 %v42_v5, %v38_v13  ;;  %v48_v19 = vld.sshfl [vmem:[#allocation1 + $0x8] sm:$0xff pattern:$0x73625140] }
  0x13   :  { %v62_v16 = vadd.f32 %v60_v9, %v43_v12  ;;  %v54_v20 = vadd.f32 %v48_v19, %v39_v14  ;;  %v51_v21 = vld.sshfl [vmem:[#allocation1 + $0x28] sm:$0xff pattern:$0x73625140] }
  0x14   :  { %v63_v18 = vadd.f32 %v61_v11, %v44_v15  ;;  %v55_v22 = vadd.f32 %v51_v21, %v40_v17 }
  0x15   :  { %66 = vst [vmem:[#allocation3] sm:$0x3] %v62_v16 }
  0x16   :  { %67 = vst [vmem:[#allocation3 + $0x2] sm:$0x3] %v63_v18 }
  0x17   :  { %64 = vst [vmem:[#allocation2] sm:$0x3] %v54_v20 }
  0x18   :  { %65 = vst [vmem:[#allocation2 + $0x2] sm:$0x3] %v55_v22 }
  0x1c   :  { %v83_v23 = vld [vmem:[#allocation3] sm:$0x3] }
  0x1d   :  { %v85_v24 = vsel %vm73_vm0, %v83_v23, 0.0  ;;  %v84_v27 = vld [vmem:[#allocation3 + $0x2] sm:$0x3] }
  0x1e   :  { %86 = vadd.xlane.f32.xlu1 %v85_v24  ;;  %v71_v25 = vld [vmem:[#allocation2] sm:$0x3]  ;;  %v88_v29 = vsel %vm73_vm0, %v84_v27, 0.0 }
  0x1f   :  { %v74_v26 = vsel %vm73_vm0, %v71_v25, 0.0  ;;  %v72_v28 = vld [vmem:[#allocation2 + $0x2] sm:$0x3] }
  0x20   :  { %75 = vadd.xlane.f32.xlu0 %v74_v26  ;;  %v77_v30 = vsel %vm73_vm0, %v72_v28, 0.0 }
  0x26   :  { %89 = vadd.xlane.f32.xlu1 %v88_v29 }
  0x28   :  { %78 = vadd.xlane.f32.xlu0 %v77_v30 }
  0x91   :  { %v87_v31 = vpop.xlane.xlu1 %86 }
  0x93   :  { %v76_v32 = vpop.xlane.xlu0 %75 }
  0x94   :  { %81 = vst.msk [vmem:[#allocation7] sm:$0x3] %vm80_vm1, %v76_v32 }
  0x95   :  { %92 = vst.msk [vmem:[#allocation7] sm:$0x3] %vm91_vm2, %v87_v31 }
  0x99   :  { %v90_v33 = vpop.xlane.xlu1 %89 }
  0x9b   :  { %v79_v34 = vpop.xlane.xlu0 %78 }
  0x9c   :  { %82 = vst.msk [vmem:[#allocation7 + $0x2] sm:$0x3] %vm80_vm1, %v79_v34 }
  0x9d   :  { %93 = vst.msk [vmem:[#allocation7 + $0x2] sm:$0x3] %vm91_vm2, %v90_v33 }
  0x9e   :  { %106 = dma.vmem_to_hbm [thread:$0]  %s99_s14, 64, %s101_s17, [#allocation6], %s179_s18, %s179_s18, %s180_s19  }
  0x9f   :  { %171 = dma.done.wait [#allocation6], 64  }
  0xa0   :  { %172 = vsyncadd [#allocation6], 4294967232 }
  0xa1   :  { %111 = vsyncpa [#allocation5], 1 }
  0xa2   :  { %112 = vsyncpa [#allocation6], 1 }

</bundles_post_ra>
